<compile_context>
chip_gen: v6e
topology: v6e:2x2x1
jax: 0.10.0
libtpu: 0.0.40
codegen_flags: <defaults>
</compile_context>

<pallas_src>
import functools
import math

import jax
import jax.numpy as jnp
from jax.experimental import pallas as pl
from jax.experimental.pallas import tpu as pltpu

LOG_SIG_MAX = 2.0
LOG_SIG_MIN = -20.0


def _round_up(x, m):
    return ((x + m - 1) // m) * m


def _gaussian_policy_kernel(state_ref, w1_ref, b1_ref, w2_ref, b2_ref,
                            wh_ref, bh_ref, out_ref, *, a_pad):
    x = state_ref[...]

    # linear1 + relu
    h = jnp.dot(x, w1_ref[...], preferred_element_type=jnp.float32)
    h = jnp.maximum(h + b1_ref[...], 0.0)

    # linear2 + relu
    h = jnp.dot(h, w2_ref[...], preferred_element_type=jnp.float32)
    h = jnp.maximum(h + b2_ref[...], 0.0)

    # fused heads: [TILE_B, 2*A_pad]; mean in lanes [0, a_pad),
    # log_std in lanes [a_pad, 2*a_pad)
    head = jnp.dot(h, wh_ref[...], preferred_element_type=jnp.float32)
    head = head + bh_ref[...]

    # both halves are 128-aligned, lane-dense stores
    out_ref[:, :a_pad] = head[:, :a_pad].astype(out_ref.dtype)
    out_ref[:, a_pad:] = jnp.clip(head[:, a_pad:], LOG_SIG_MIN,
                                  LOG_SIG_MAX).astype(out_ref.dtype)


def pack_params(params):
    """One-time packing of PyTorch-convention params for the kernel.

    params: dict with
        w1: [H, D], b1: [H]
        w2: [H, H], b2: [H]
        wm: [A, H], bm: [A]
        ws: [A, H], bs: [A]
    Returns (arrays_dict, meta_dict) where arrays are transposed to [in, out],
    zero-padded to 128-lane boundaries, and the two heads are fused.
    """
    H, D = params["w1"].shape
    A = params["wm"].shape[0]
    D_pad = _round_up(D, 128)
    H_pad = _round_up(H, 128)
    A_pad = _round_up(A, 128)

    f32 = jnp.float32
    w1 = jnp.zeros((D_pad, H_pad), f32).at[:D, :H].set(params["w1"].T)
    b1 = jnp.zeros((1, H_pad), f32).at[0, :H].set(params["b1"])
    w2 = jnp.zeros((H_pad, H_pad), f32).at[:H, :H].set(params["w2"].T)
    b2 = jnp.zeros((1, H_pad), f32).at[0, :H].set(params["b2"])
    # fused head weight/bias: mean -> lanes [0, A), log_std -> lanes [A_pad, A_pad+A)
    wh = (jnp.zeros((H_pad, 2 * A_pad), f32)
          .at[:H, :A].set(params["wm"].T)
          .at[:H, A_pad:A_pad + A].set(params["ws"].T))
    bh = (jnp.zeros((1, 2 * A_pad), f32)
          .at[0, :A].set(params["bm"])
          .at[0, A_pad:A_pad + A].set(params["bs"]))

    arrays = {"w1": w1, "b1": b1, "w2": w2, "b2": b2, "wh": wh, "bh": bh}
    meta = {"D": D, "H": H, "A": A, "D_pad": D_pad, "H_pad": H_pad,
            "A_pad": A_pad}
    return arrays, meta


def gaussian_policy_forward(state, packed, meta, *, tile_b=256):
    """GaussianPolicy.forward. state: [B, D] f32 -> (mean [B, A], log_std [B, A])."""
    B, D = state.shape
    assert D == meta["D"]
    D_pad, A, A_pad = meta["D_pad"], meta["A"], meta["A_pad"]

    tile_b = min(tile_b, _round_up(B, 8))
    B_pad = _round_up(B, tile_b)

    # zero-pad batch rows and feature lanes (zeros are inert through the MLP)
    state_p = jnp.zeros((B_pad, D_pad), jnp.float32).at[:B, :D].set(state)

    grid = (B_pad // tile_b,)

    def full(a):
        nd = a.ndim
        return pl.BlockSpec(a.shape, lambda i, _nd=nd: (0,) * _nd)

    kernel = functools.partial(_gaussian_policy_kernel, a_pad=A_pad)

    out = pl.pallas_call(
        kernel,
        out_shape=jax.ShapeDtypeStruct((B_pad, 2 * A_pad), jnp.float32),
        grid=grid,
        in_specs=[
            pl.BlockSpec((tile_b, D_pad), lambda i: (i, 0)),   # state: tiled over B
            full(packed["w1"]), full(packed["b1"]),            # weights: VMEM-resident
            full(packed["w2"]), full(packed["b2"]),
            full(packed["wh"]), full(packed["bh"]),
        ],
        out_specs=pl.BlockSpec((tile_b, 2 * A_pad), lambda i: (i, 0)),
        compiler_params=pltpu.CompilerParams(
            dimension_semantics=("parallel",)),
    )(state_p, packed["w1"], packed["b1"], packed["w2"], packed["b2"],
      packed["wh"], packed["bh"])

    mean = out[:B, :A]
    log_std = out[:B, A_pad:A_pad + A]
    return mean, log_std


def _xavier_uniform(key, shape):
    # shape = (out_features, in_features); gain=1, matches torch.nn.init.xavier_uniform_
    fan_out, fan_in = shape
    bound = math.sqrt(6.0 / (fan_in + fan_out))
    return jax.random.uniform(key, shape, jnp.float32, -bound, bound)


def init_params(key, num_inputs, num_actions, hidden_dim):
    k1, k2, k3, k4 = jax.random.split(key, 4)
    return {
        "w1": _xavier_uniform(k1, (hidden_dim, num_inputs)),
        "b1": jnp.zeros((hidden_dim,), jnp.float32),
        "w2": _xavier_uniform(k2, (hidden_dim, hidden_dim)),
        "b2": jnp.zeros((hidden_dim,), jnp.float32),
        "wm": _xavier_uniform(k3, (num_actions, hidden_dim)),
        "bm": jnp.zeros((num_actions,), jnp.float32),
        "ws": _xavier_uniform(k4, (num_actions, hidden_dim)),
        "bs": jnp.zeros((num_actions,), jnp.float32),
    }


if __name__ == "__main__":
    key = jax.random.PRNGKey(0)
    k_params, k_state = jax.random.split(key)

    batch, num_inputs, num_actions, hidden_dim = 8, 16, 4, 32
    params = init_params(k_params, num_inputs, num_actions, hidden_dim)
    state = jax.random.normal(k_state, (batch, num_inputs), jnp.float32)

    # One-time packing (out of the per-call hot path).
    packed, meta = pack_params(params)
    packed = jax.tree_util.tree_map(jax.block_until_ready, packed)

    mean, log_std = gaussian_policy_forward(state, packed, meta)
    jax.block_until_ready((mean, log_std))

    # Pure-JAX reference check.
    h = jnp.maximum(state @ params["w1"].T + params["b1"], 0.0)
    h = jnp.maximum(h @ params["w2"].T + params["b2"], 0.0)
    ref_mean = h @ params["wm"].T + params["bm"]
    ref_log_std = jnp.clip(h @ params["ws"].T + params["bs"],
                           LOG_SIG_MIN, LOG_SIG_MAX)
    assert mean.shape == (batch, num_actions)
    assert log_std.shape == (batch, num_actions)
    assert jnp.allclose(mean, ref_mean, atol=1e-5), "mean mismatch"
    assert jnp.allclose(log_std, ref_log_std, atol=1e-5), "log_std mismatch"

    print("KERNEL_OK")
</pallas_src>

<mosaic_0001>
module attributes {stable_mosaic.version = 11 : i64} {
  func.func @_gaussian_policy_kernel(%arg0: i32, %arg1: memref<8x128xf32, #tpu.memory_space<vmem>>, %arg2: memref<128x128xf32, #tpu.memory_space<vmem>>, %arg3: memref<1x128xf32, #tpu.memory_space<vmem>>, %arg4: memref<128x128xf32, #tpu.memory_space<vmem>>, %arg5: memref<1x128xf32, #tpu.memory_space<vmem>>, %arg6: memref<128x256xf32, #tpu.memory_space<vmem>>, %arg7: memref<1x256xf32, #tpu.memory_space<vmem>>, %arg8: memref<8x256xf32, #tpu.memory_space<vmem>>) attributes {dimension_semantics = [#tpu.dimension_semantics<parallel>], iteration_bounds = array<i64: 1>, scalar_prefetch = 0 : i64, scratch_operands = 0 : i64, tpu.core_type = #tpu.core_type<tc>, window_params = [{transform_indices = @transform_0, window_bounds = array<i64: 8, 128>}, {pipeline_mode = #tpu.pipeline_mode<synchronous>, transform_indices = @transform_1, window_bounds = array<i64: 128, 128>}, {pipeline_mode = #tpu.pipeline_mode<synchronous>, transform_indices = @transform_2, window_bounds = array<i64: 1, 128>}, {pipeline_mode = #tpu.pipeline_mode<synchronous>, transform_indices = @transform_3, window_bounds = array<i64: 128, 128>}, {pipeline_mode = #tpu.pipeline_mode<synchronous>, transform_indices = @transform_4, window_bounds = array<i64: 1, 128>}, {pipeline_mode = #tpu.pipeline_mode<synchronous>, transform_indices = @transform_5, window_bounds = array<i64: 128, 256>}, {pipeline_mode = #tpu.pipeline_mode<synchronous>, transform_indices = @transform_6, window_bounds = array<i64: 1, 256>}, {transform_indices = @transform_7, window_bounds = array<i64: 8, 256>}]} {
    %c0 = arith.constant 0 : index
    %c0_0 = arith.constant 0 : index
    %0 = vector.load %arg1[%c0, %c0_0] : memref<8x128xf32, #tpu.memory_space<vmem>>, vector<8x128xf32>
    %c0_1 = arith.constant 0 : index
    %c0_2 = arith.constant 0 : index
    %1 = vector.load %arg2[%c0_1, %c0_2] : memref<128x128xf32, #tpu.memory_space<vmem>>, vector<128x128xf32>
    %cst = arith.constant dense<0.000000e+00> : vector<8x128xf32>
    %2 = tpu.matmul %0, %1, %cst {dimension_numbers = #tpu.dot_dimension_numbers<[1], [0], [0], [1], [0, 0, 1, 1], [], []>} : vector<8x128xf32>, vector<128x128xf32>, vector<8x128xf32> -> vector<8x128xf32>
    %c0_3 = arith.constant 0 : index
    %c0_4 = arith.constant 0 : index
    %3 = vector.load %arg3[%c0_3, %c0_4] : memref<1x128xf32, #tpu.memory_space<vmem>>, vector<1x128xf32>
    %4 = vector.broadcast %3 : vector<1x128xf32> to vector<8x128xf32>
    %5 = arith.addf %2, %4 : vector<8x128xf32>
    %cst_5 = arith.constant 0.000000e+00 : f32
    %6 = vector.broadcast %cst_5 : f32 to vector<8x128xf32>
    %7 = arith.maximumf %5, %6 : vector<8x128xf32>
    %c0_6 = arith.constant 0 : index
    %c0_7 = arith.constant 0 : index
    %8 = vector.load %arg4[%c0_6, %c0_7] : memref<128x128xf32, #tpu.memory_space<vmem>>, vector<128x128xf32>
    %cst_8 = arith.constant dense<0.000000e+00> : vector<8x128xf32>
    %9 = tpu.matmul %7, %8, %cst_8 {dimension_numbers = #tpu.dot_dimension_numbers<[1], [0], [0], [1], [0, 0, 1, 1], [], []>} : vector<8x128xf32>, vector<128x128xf32>, vector<8x128xf32> -> vector<8x128xf32>
    %c0_9 = arith.constant 0 : index
    %c0_10 = arith.constant 0 : index
    %10 = vector.load %arg5[%c0_9, %c0_10] : memref<1x128xf32, #tpu.memory_space<vmem>>, vector<1x128xf32>
    %11 = vector.broadcast %10 : vector<1x128xf32> to vector<8x128xf32>
    %12 = arith.addf %9, %11 : vector<8x128xf32>
    %cst_11 = arith.constant 0.000000e+00 : f32
    %13 = vector.broadcast %cst_11 : f32 to vector<8x128xf32>
    %14 = arith.maximumf %12, %13 : vector<8x128xf32>
    %c0_12 = arith.constant 0 : index
    %c0_13 = arith.constant 0 : index
    %15 = vector.load %arg6[%c0_12, %c0_13] : memref<128x256xf32, #tpu.memory_space<vmem>>, vector<128x256xf32>
    %cst_14 = arith.constant dense<0.000000e+00> : vector<8x256xf32>
    %16 = tpu.matmul %14, %15, %cst_14 {dimension_numbers = #tpu.dot_dimension_numbers<[1], [0], [0], [1], [0, 0, 1, 1], [], []>} : vector<8x128xf32>, vector<128x256xf32>, vector<8x256xf32> -> vector<8x256xf32>
    %c0_15 = arith.constant 0 : index
    %c0_16 = arith.constant 0 : index
    %17 = vector.load %arg7[%c0_15, %c0_16] : memref<1x256xf32, #tpu.memory_space<vmem>>, vector<1x256xf32>
    %18 = vector.broadcast %17 : vector<1x256xf32> to vector<8x256xf32>
    %19 = arith.addf %16, %18 : vector<8x256xf32>
    %20 = vector.extract_strided_slice %19 {offsets = [0, 0], sizes = [8, 128], strides = [1, 1]} : vector<8x256xf32> to vector<8x128xf32>
    %c0_17 = arith.constant 0 : index
    %c0_18 = arith.constant 0 : index
    %21 = vector.load %arg8[%c0_17, %c0_18] : memref<8x256xf32, #tpu.memory_space<vmem>>, vector<8x128xf32>
    tpu.vector_store %arg8[%c0_17, %c0_18], %20 {strides = array<i32>} : memref<8x256xf32, #tpu.memory_space<vmem>>, vector<8x128xf32>,
    %22 = vector.extract_strided_slice %19 {offsets = [0, 128], sizes = [8, 128], strides = [1, 1]} : vector<8x256xf32> to vector<8x128xf32>
    %cst_19 = arith.constant -2.000000e+01 : f32
    %cst_20 = arith.constant 2.000000e+00 : f32
    %23 = vector.broadcast %cst_19 : f32 to vector<8x128xf32>
    %24 = arith.maximumf %23, %22 : vector<8x128xf32>
    %25 = vector.broadcast %cst_20 : f32 to vector<8x128xf32>
    %26 = arith.minimumf %25, %24 : vector<8x128xf32>
    %c0_21 = arith.constant 0 : index
    %c128 = arith.constant 128 : index
    %27 = vector.load %arg8[%c0_21, %c128] : memref<8x256xf32, #tpu.memory_space<vmem>>, vector<8x128xf32>
    tpu.vector_store %arg8[%c0_21, %c128], %26 {strides = array<i32>} : memref<8x256xf32, #tpu.memory_space<vmem>>, vector<8x128xf32>,
    return
  }
  func.func @transform_0(%arg0: i32) -> (i32, i32) {
    %c0_i32 = arith.constant 0 : i32
    %c0_i32_0 = arith.constant 0 : i32
    return %arg0, %c0_i32 : i32, i32
  }
  func.func @transform_1(%arg0: i32) -> (i32, i32) {
    %c0_i32 = arith.constant 0 : i32
    %c0_i32_0 = arith.constant 0 : i32
    %c0_i32_1 = arith.constant 0 : i32
    return %c0_i32, %c0_i32_0 : i32, i32
  }
  func.func @transform_2(%arg0: i32) -> (i32, i32) {
    %c0_i32 = arith.constant 0 : i32
    %c0_i32_0 = arith.constant 0 : i32
    %c0_i32_1 = arith.constant 0 : i32
    return %c0_i32, %c0_i32_0 : i32, i32
  }
  func.func @transform_3(%arg0: i32) -> (i32, i32) {
    %c0_i32 = arith.constant 0 : i32
    %c0_i32_0 = arith.constant 0 : i32
    %c0_i32_1 = arith.constant 0 : i32
    return %c0_i32, %c0_i32_0 : i32, i32
  }
  func.func @transform_4(%arg0: i32) -> (i32, i32) {
    %c0_i32 = arith.constant 0 : i32
    %c0_i32_0 = arith.constant 0 : i32
    %c0_i32_1 = arith.constant 0 : i32
    return %c0_i32, %c0_i32_0 : i32, i32
  }
  func.func @transform_5(%arg0: i32) -> (i32, i32) {
    %c0_i32 = arith.constant 0 : i32
    %c0_i32_0 = arith.constant 0 : i32
    %c0_i32_1 = arith.constant 0 : i32
    return %c0_i32, %c0_i32_0 : i32, i32
  }
  func.func @transform_6(%arg0: i32) -> (i32, i32) {
    %c0_i32 = arith.constant 0 : i32
    %c0_i32_0 = arith.constant 0 : i32
    %c0_i32_1 = arith.constant 0 : i32
    return %c0_i32, %c0_i32_0 : i32, i32
  }
  func.func @transform_7(%arg0: i32) -> (i32, i32) {
    %c0_i32 = arith.constant 0 : i32
    %c0_i32_0 = arith.constant 0 : i32
    return %arg0, %c0_i32 : i32, i32
  }
}

</mosaic_0001>

<bundles_post_ra>
// kernel: tpu_custom_call.1
= control target key start
LH: loop header
LB: loop body
LE: loop exit
PB: predicated region body
PF: predicated region fallthrough
CT: control target
= control target key end

     0   :  { %12 = vsyncpa [#allocation3], 0  ;;  %s740_s0 = inlined_call_operand.hbm [shape: f32[8,128], index: 0, kind: input, shape index: {}]   ;;  %s741_s1 = inlined_call_operand.hbm [shape: f32[128,128], index: 1, kind: input, shape index: {}]   ;;  %s742_s2 = inlined_call_operand.vmem [shape: f32[1,128], index: 2, kind: input, shape index: {}]   ;;  %s743_s3 = inlined_call_operand.hbm [shape: f32[128,128], index: 3, kind: input, shape index: {}]   ;;  %s744_s4 = inlined_call_operand.vmem [shape: f32[1,128], index: 4, kind: input, shape index: {}]   ;;  %s745_s5 = inlined_call_operand.hbm [shape: f32[128,256], index: 5, kind: input, shape index: {}]   ;;  %s746_s6 = inlined_call_operand.vmem [shape: f32[1,256], index: 6, kind: input, shape index: {}]   ;;  %s747_s7 = inlined_call_operand.hbm [shape: f32[8,256], index: 7, kind: output, shape index: {}]  }
   0x1   :  { %13 = vsyncpa [#allocation6], 0 }
   0x2   :  { %14 = vsyncpa [#allocation9], 0 }
   0x3   :  { %15 = vsyncpa [#allocation4], 0  ;;  %s630_s24 = smov [#allocation5]  }
   0x4   :  { %s31_s25 = sshll.u32 %s630_s24, 4  ;;  %s32_s25 = int_to_ptr.vmem [resolvable:$true] %s31_s25 }
   0x5   :  { %s530_s26 = scalar_lea.vmem %s32_s25, 2048  ;;  %p535_p1 = scmp.lt.s32.totalorder %s32_s25, %s32_s25 }
   0x6   :  { %p531_p0 = scmp.ne.s32.totalorder %s32_s25, %s530_s26  ;;  %p536_p2 = scmp.lt.s32.totalorder %s530_s26, %s530_s26 }
   0x8   :  { %p537_p3 = por %p536_p2, %p535_p1 }
   0xa   :  { %p538_p4 = pnand %p537_p3, %p531_p0 }
   0xc   :  { %541 = shalt.err (!%p538_p4)
}
   0xd   :  { %s631_s27 = smov 128   ;;  %s632_s28 = smov 8  }
   0xe   :  { %37 = dma.hbm_to_vmem [thread:$0]  %s741_s1, 2048, %s32_s25, [#allocation6], %s631_s27, %s631_s27, %s632_s28  }
   0xf   :  { %s633_s8 = smov [#allocation2]   ;;  %s634_s10 = smov [#allocation7]  }
  0x10   :  { %s22_s9 = sshll.u32 %s633_s8, 4  ;;  %s45_s11 = sshll.u32 %s634_s10, 4  ;;  %s23_s9 = int_to_ptr.vmem [resolvable:$true] %s22_s9  ;;  %s46_s11 = int_to_ptr.vmem [resolvable:$true] %s45_s11 }
  0x11   :  { %s550_s12 = scalar_lea.vmem %s23_s9, 128  ;;  %p555_p6 = scmp.lt.s32.totalorder %s23_s9, %s23_s9 }
  0x12   :  { %p551_p5 = scmp.ne.s32.totalorder %s23_s9, %s550_s12  ;;  %p556_p7 = scmp.lt.s32.totalorder %s550_s12, %s550_s12 }
  0x14   :  { %p557_p8 = por %p556_p7, %p555_p6 }
  0x16   :  { %p558_p9 = pnand %p557_p8, %p551_p5 }
  0x18   :  { %561 = shalt.err (!%p558_p9)
}
  0x19   :  { %25 = dma.hbm_to_vmem [thread:$0]  %s740_s0, 128, %s23_s9, [#allocation3]  }
  0x1a   :  { %s570_s15 = scalar_lea.vmem %s46_s11, 2048  ;;  %p575_p11 = scmp.lt.s32.totalorder %s46_s11, %s46_s11 }
  0x1b   :  { %p571_p10 = scmp.ne.s32.totalorder %s46_s11, %s570_s15  ;;  %p576_p12 = scmp.lt.s32.totalorder %s570_s15, %s570_s15 }
  0x1d   :  { %p577_p13 = por %p576_p12, %p575_p11 }
  0x1f   :  { %p578_p0 = pnand %p577_p13, %p571_p10 }
  0x21   :  { %581 = shalt.err (!%p578_p0)
}
  0x22   :  { %51 = dma.hbm_to_vmem [thread:$0]  %s743_s3, 2048, %s46_s11, [#allocation6], %s631_s27, %s631_s27, %s632_s28  }
  0x23   :  { %s635_s17 = smov [#allocation8]  }
  0x24   :  { %s59_s18 = sshll.u32 %s635_s17, 4  ;;  %s60_s18 = int_to_ptr.vmem [resolvable:$true] %s59_s18 }
  0x25   :  { %s590_s19 = scalar_lea.vmem %s60_s18, 4096  ;;  %p595_p2 = scmp.lt.s32.totalorder %s60_s18, %s60_s18 }
  0x26   :  { %p591_p1 = scmp.ne.s32.totalorder %s60_s18, %s590_s19  ;;  %p596_p3 = scmp.lt.s32.totalorder %s590_s19, %s590_s19 }
  0x28   :  { %p597_p4 = por %p596_p3, %p595_p2 }
  0x2a   :  { %p598_p5 = pnand %p597_p4, %p591_p1 }
  0x2c   :  { %601 = shalt.err (!%p598_p5)
}
  0x2d   :  { %s636_s0 = smov 256   ;;  %s637_s20 = smov 16  }
  0x2e   :  { %65 = dma.hbm_to_vmem [thread:$0]  %s745_s5, 4096, %s60_s18, [#allocation9], %s636_s0, %s636_s0, %s637_s20  }
  0x2f   :  { %622 = dma.done.wait [#allocation3], 128  }
  0x30   :  { %623 = vsyncadd [#allocation3], 4294967168 }
  0x31   :  { %624 = dma.done.wait [#allocation6], 4096  }
  0x32   :  { %625 = vsyncadd [#allocation6], 4294963200 }
  0x33   :  { %626 = dma.done.wait [#allocation9], 4096  }
  0x34   :  { %627 = vsyncadd [#allocation9], 4294963200  ;;  %v638_v0 = vmov 0.0   ;;  %vm639_vm0 = vmmov 0   ;;  %v96_v1 = vld [vmem:[#allocation5 + $0x78] sm:$0xff]  ;;  %v95_v2 = vld [vmem:[#allocation5 + $0x70] sm:$0xff] }
  0x35   :  { %441 = vmatprep.subr.mxu0 %v638_v0  ;;  %473 = vmatprep.mubr.msk.f32.mxu0 %vm639_vm0, %v638_v0  ;;  %v94_v3 = vld [vmem:[#allocation5 + $0x68] sm:$0xff]  ;;  %v93_v4 = vld [vmem:[#allocation5 + $0x60] sm:$0xff]  ;;  %v190_v5 = vld [vmem:[#allocation7 + $0x78] sm:$0xff] }
  0x36   :  { %476 = vmatprep.subr.mxu1 %v638_v0  ;;  %508 = vmatprep.mubr.msk.f32.mxu1 %vm639_vm0, %v638_v0  ;;  %v92_v6 = vld [vmem:[#allocation5 + $0x58] sm:$0xff]  ;;  %v189_v7 = vld [vmem:[#allocation7 + $0x70] sm:$0xff]  ;;  %v188_v8 = vld [vmem:[#allocation7 + $0x68] sm:$0xff] }
  0x37   :  { %442 = vmatpush3.msra.mxu0 %v96_v1  ;;  %477 = vmatpush3.msra.mxu1 %v190_v5  ;;  %v91_v9 = vld [vmem:[#allocation5 + $0x50] sm:$0xff]  ;;  %v187_v10 = vld [vmem:[#allocation7 + $0x60] sm:$0xff]  ;;  %v90_v11 = vld [vmem:[#allocation5 + $0x48] sm:$0xff] }
  0x38   :  { %443 = vmatprep.subr.mxu0 %v638_v0  ;;  %478 = vmatprep.subr.mxu1 %v638_v0  ;;  %v186_v12 = vld [vmem:[#allocation7 + $0x58] sm:$0xff]  ;;  %v89_v13 = vld [vmem:[#allocation5 + $0x40] sm:$0xff]  ;;  %v185_v14 = vld [vmem:[#allocation7 + $0x50] sm:$0xff] }
  0x39   :  { %444 = vmatpush3.msra.mxu0 %v95_v2  ;;  %479 = vmatpush3.msra.mxu1 %v189_v7  ;;  %v88_v15 = vld [vmem:[#allocation5 + $0x38] sm:$0xff]  ;;  %v184_v16 = vld [vmem:[#allocation7 + $0x48] sm:$0xff]  ;;  %v87_v17 = vld [vmem:[#allocation5 + $0x30] sm:$0xff] }
  0x3a   :  { %445 = vmatprep.subr.mxu0 %v638_v0  ;;  %480 = vmatprep.subr.mxu1 %v638_v0  ;;  %v183_v18 = vld [vmem:[#allocation7 + $0x40] sm:$0xff]  ;;  %v86_v19 = vld [vmem:[#allocation5 + $0x28] sm:$0xff]  ;;  %v182_v20 = vld [vmem:[#allocation7 + $0x38] sm:$0xff] }
  0x3b   :  { %446 = vmatpush3.msra.mxu0 %v94_v3  ;;  %481 = vmatpush3.msra.mxu1 %v188_v8  ;;  %v85_v21 = vld [vmem:[#allocation5 + $0x20] sm:$0xff]  ;;  %v181_v22 = vld [vmem:[#allocation7 + $0x30] sm:$0xff]  ;;  %v84_v23 = vld [vmem:[#allocation5 + $0x18] sm:$0xff] }
  0x3c   :  { %447 = vmatprep.subr.mxu0 %v638_v0  ;;  %482 = vmatprep.subr.mxu1 %v638_v0  ;;  %v180_v24 = vld [vmem:[#allocation7 + $0x28] sm:$0xff]  ;;  %v83_v25 = vld [vmem:[#allocation5 + $0x10] sm:$0xff]  ;;  %v179_v26 = vld [vmem:[#allocation7 + $0x20] sm:$0xff] }
  0x3d   :  { %448 = vmatpush3.msra.mxu0 %v93_v4  ;;  %483 = vmatpush3.msra.mxu1 %v187_v10  ;;  %v82_v27 = vld [vmem:[#allocation5 + $0x8] sm:$0xff]  ;;  %v178_v28 = vld [vmem:[#allocation7 + $0x18] sm:$0xff]  ;;  %v81_v29 = vld [vmem:[#allocation5] sm:$0xff] }
  0x3e   :  { %449 = vmatprep.subr.mxu0 %v638_v0  ;;  %484 = vmatprep.subr.mxu1 %v638_v0  ;;  %v80_v30 = vld [vmem:[#allocation2] sm:$0xff]  ;;  %v177_v31 = vld [vmem:[#allocation7 + $0x10] sm:$0xff]  ;;  %v176_v32 = vld [vmem:[#allocation7 + $0x8] sm:$0xff] }
  0x3f   :  { %450 = vmatpush3.msra.mxu0 %v92_v6  ;;  %485 = vmatpush3.msra.mxu1 %v186_v12  ;;  %v175_v33 = vld [vmem:[#allocation7] sm:$0xff]  ;;  %v300_v34 = vld [vmem:[#allocation8 + $0xf8] sm:$0xff]  ;;  %v299_v35 = vld [vmem:[#allocation8 + $0xf0] sm:$0xff]  ;;  %v303_v12 = vlaneseq }
  0x40   :  { %451 = vmatprep.subr.mxu0 %v638_v0  ;;  %486 = vmatprep.subr.mxu1 %v638_v0  ;;  %v298_v36 = vld [vmem:[#allocation8 + $0xe8] sm:$0xff]  ;;  %v297_v37 = vld [vmem:[#allocation8 + $0xe0] sm:$0xff]  ;;  %v296_v38 = vld [vmem:[#allocation8 + $0xd8] sm:$0xff] }
  0x41   :  { %452 = vmatpush3.msra.mxu0 %v91_v9  ;;  %487 = vmatpush3.msra.mxu1 %v185_v14  ;;  %v295_v39 = vld [vmem:[#allocation8 + $0xd0] sm:$0xff]  ;;  %v294_v40 = vld [vmem:[#allocation8 + $0xc8] sm:$0xff]  ;;  %v293_v41 = vld [vmem:[#allocation8 + $0xc0] sm:$0xff] }
  0x42   :  { %453 = vmatprep.subr.mxu0 %v638_v0  ;;  %488 = vmatprep.subr.mxu1 %v638_v0  ;;  %v292_v42 = vld [vmem:[#allocation8 + $0xb8] sm:$0xff]  ;;  %v291_v43 = vld [vmem:[#allocation8 + $0xb0] sm:$0xff]  ;;  %v290_v44 = vld [vmem:[#allocation8 + $0xa8] sm:$0xff] }
  0x43   :  { %454 = vmatpush3.msra.mxu0 %v90_v11  ;;  %489 = vmatpush3.msra.mxu1 %v184_v16  ;;  %v289_v45 = vld [vmem:[#allocation8 + $0xa0] sm:$0xff]  ;;  %v288_v46 = vld [vmem:[#allocation8 + $0x98] sm:$0xff]  ;;  %v287_v47 = vld [vmem:[#allocation8 + $0x90] sm:$0xff] }
  0x44   :  { %455 = vmatprep.subr.mxu0 %v638_v0  ;;  %490 = vmatprep.subr.mxu1 %v638_v0  ;;  %v286_v48 = vld [vmem:[#allocation8 + $0x88] sm:$0xff]  ;;  %v285_v49 = vld [vmem:[#allocation8 + $0x80] sm:$0xff]  ;;  %v284_v50 = vld [vmem:[#allocation8 + $0x78] sm:$0xff] }
  0x45   :  { %456 = vmatpush3.msra.mxu0 %v89_v13  ;;  %491 = vmatpush3.msra.mxu1 %v183_v18  ;;  %v283_v51 = vld [vmem:[#allocation8 + $0x70] sm:$0xff]  ;;  %v282_v52 = vld [vmem:[#allocation8 + $0x68] sm:$0xff]  ;;  %v281_v53 = vld [vmem:[#allocation8 + $0x60] sm:$0xff]  ;;  %v304_v13 = vshrl.u32 %v303_v12, 7 }
  0x46   :  { %457 = vmatprep.subr.mxu0 %v638_v0  ;;  %492 = vmatprep.subr.mxu1 %v638_v0  ;;  %v280_v54 = vld [vmem:[#allocation8 + $0x58] sm:$0xff]  ;;  %v279_v55 = vld [vmem:[#allocation8 + $0x50] sm:$0xff]  ;;  %v278_v56 = vld [vmem:[#allocation8 + $0x48] sm:$0xff] }
  0x47   :  { %458 = vmatpush3.msra.mxu0 %v88_v15  ;;  %493 = vmatpush3.msra.mxu1 %v182_v20  ;;  %v277_v57 = vld [vmem:[#allocation8 + $0x40] sm:$0xff]  ;;  %v276_v58 = vld [vmem:[#allocation8 + $0x38] sm:$0xff]  ;;  %v275_v59 = vld [vmem:[#allocation8 + $0x30] sm:$0xff]  ;;  %v305_v14 = vsub.s32 0, %v304_v13  ;;  %v309_v16 = vsub.s32 1, %v304_v13 }
  0x48   :  { %459 = vmatprep.subr.mxu0 %v638_v0  ;;  %494 = vmatprep.subr.mxu1 %v638_v0  ;;  %v274_v60 = vld [vmem:[#allocation8 + $0x28] sm:$0xff]  ;;  %v405_v61 = vld [vmem:[%s742_s2] ss:$0 sm:$0xff]  ;;  %v273_v2 = vld [vmem:[#allocation8 + $0x20] sm:$0xff] }
  0x49   :  { %460 = vmatpush3.msra.mxu0 %v87_v17  ;;  %495 = vmatpush3.msra.mxu1 %v181_v22  ;;  %v272_v3 = vld [vmem:[#allocation8 + $0x18] sm:$0xff]  ;;  %v271_v4 = vld [vmem:[#allocation8 + $0x10] sm:$0xff]  ;;  %v270_v5 = vld [vmem:[#allocation8 + $0x8] sm:$0xff] }
  0x4a   :  { %461 = vmatprep.subr.mxu0 %v638_v0  ;;  %496 = vmatprep.subr.mxu1 %v638_v0  ;;  %v269_v6 = vld [vmem:[#allocation8] sm:$0xff]  ;;  %v406_v7 = vld [vmem:[%s744_s4] ss:$0 sm:$0xff]  ;;  %s640_s4 = smov [#allocation10]  }
  0x4b   :  { %462 = vmatpush3.msra.mxu0 %v86_v19  ;;  %497 = vmatpush3.msra.mxu1 %v180_v24  ;;  %v301_v15 = vld [vmem:[%s746_s6] sm:$0x3]  ;;  %s394_s26 = sshll.u32 %s640_s4, 4  ;;  %s395_s26 = int_to_ptr.vmem [resolvable:$true] %s394_s26 }
  0x4c   :  { %463 = vmatprep.subr.mxu0 %v638_v0  ;;  %498 = vmatprep.subr.mxu1 %v638_v0  ;;  %v306_v17 = vrot.slane %v301_v15, %v305_v14  ;;  %v310_v18 = vrot.slane %v301_v15, %v309_v16  ;;  %s602_s27 = scalar_lea.vmem %s395_s26, 256  ;;  %p607_p7 = scmp.lt.s32.totalorder %s395_s26, %s395_s26 }
  0x4d   :  { %464 = vmatpush3.msra.mxu0 %v85_v21  ;;  %499 = vmatpush3.msra.mxu1 %v179_v26  ;;  %p603_p6 = scmp.ne.s32.totalorder %s395_s26, %s602_s27  ;;  %p608_p8 = scmp.lt.s32.totalorder %s602_s27, %s602_s27 }
  0x4e   :  { %465 = vmatprep.subr.mxu0 %v638_v0  ;;  %500 = vmatprep.subr.mxu1 %v638_v0 }
  0x4f   :  { %466 = vmatpush3.msra.mxu0 %v84_v23  ;;  %501 = vmatpush3.msra.mxu1 %v178_v28  ;;  %p609_p9 = por %p608_p8, %p607_p7 }
  0x50   :  { %467 = vmatprep.subr.mxu0 %v638_v0  ;;  %502 = vmatprep.subr.mxu1 %v638_v0 }
  0x51   :  { %468 = vmatpush3.msra.mxu0 %v83_v25  ;;  %503 = vmatpush3.msra.mxu1 %v177_v31  ;;  %p610_p10 = pnand %p609_p9, %p603_p6 }
  0x52   :  { %469 = vmatprep.subr.mxu0 %v638_v0  ;;  %504 = vmatprep.subr.mxu1 %v638_v0 }
  0x53   :  { %470 = vmatpush3.msra.mxu0 %v82_v27  ;;  %505 = vmatpush3.msra.mxu1 %v176_v32 }
  0x54   :  { %471 = vmatprep.subr.mxu0 %v638_v0  ;;  %506 = vmatprep.subr.mxu1 %v638_v0 }
  0x55   :  { %472 = vmatpush3.msra.mxu0 %v81_v29  ;;  %507 = vmatpush3.msra.mxu1 %v175_v33 }
  0x56   :  { %474 = vmatmul.mubr.f32.vlgmr.msra.gmra.mxu0 %v80_v30  ;;  %313 = vmatprep.subr.mxu0 %v300_v34 }
  0x57   :  { %377 = vmatprep.mubr.f32.mxu0 %v638_v0  ;;  %314 = vmatpush1.msra.mxu0 %v299_v35 }
  0x58   :  { %315 = vmatprep.subr.mxu0 %v298_v36 }
  0x59   :  { %316 = vmatpush1.msra.mxu0 %v297_v37 }
  0x5a   :  { %317 = vmatprep.subr.mxu0 %v296_v38 }
  0x5b   :  { %318 = vmatpush1.msra.mxu0 %v295_v39 }
  0x5c   :  { %319 = vmatprep.subr.mxu0 %v294_v40 }
  0x5d   :  { %320 = vmatpush1.msra.mxu0 %v293_v41 }
  0x5e   :  { %321 = vmatprep.subr.mxu0 %v292_v42 }
  0x5f   :  { %322 = vmatpush1.msra.mxu0 %v291_v43 }
  0x60   :  { %323 = vmatprep.subr.mxu0 %v290_v44 }
  0x61   :  { %324 = vmatpush1.msra.mxu0 %v289_v45 }
  0x62   :  { %325 = vmatprep.subr.mxu0 %v288_v46 }
  0x63   :  { %326 = vmatpush1.msra.mxu0 %v287_v47 }
  0x64   :  { %327 = vmatprep.subr.mxu0 %v286_v48 }
  0x65   :  { %328 = vmatpush1.msra.mxu0 %v285_v49 }
  0x66   :  { %329 = vmatprep.subr.mxu0 %v284_v50 }
  0x67   :  { %330 = vmatpush1.msra.mxu0 %v283_v51 }
  0x68   :  { %331 = vmatprep.subr.mxu0 %v282_v52 }
  0x69   :  { %332 = vmatpush1.msra.mxu0 %v281_v53 }
  0x6a   :  { %333 = vmatprep.subr.mxu0 %v280_v54 }
  0x6b   :  { %334 = vmatpush1.msra.mxu0 %v279_v55 }
  0x6c   :  { %335 = vmatprep.subr.mxu0 %v278_v56 }
  0x6d   :  { %336 = vmatpush1.msra.mxu0 %v277_v57 }
  0x6e   :  { %337 = vmatprep.subr.mxu0 %v276_v58 }
  0x6f   :  { %338 = vmatpush1.msra.mxu0 %v275_v59 }
  0x70   :  { %339 = vmatprep.subr.mxu0 %v274_v60 }
  0x71   :  { %340 = vmatpush1.msra.mxu0 %v273_v2 }
  0x72   :  { %341 = vmatprep.subr.mxu0 %v272_v3 }
  0x73   :  { %342 = vmatpush1.msra.mxu0 %v271_v4 }
  0x74   :  { %343 = vmatprep.subr.mxu0 %v270_v5 }
  0x75   :  { %344 = vmatpush1.msra.mxu0 %v269_v6 }
 0x116   :  { %v170_v62 = vpop.f32.mrf.mxu0 }
 0x117   :  { %v171_v63 = vadd.f32 %v405_v61, %v170_v62 }
 0x118   :  { %v475_v0 = vpop.f32.mrf.mxu0 }
 0x119   :  { %v174_v1 = vmax.f32 %v171_v63, 0.0 }
 0x11b   :  { %509 = vmatmul.mubr.f32.vlgmr.msra.gmra.mxu1 %v174_v1 }
 0x1db   :  { %v264_v8 = vpop.f32.mrf.mxu1 }
 0x1dc   :  { %v265_v9 = vadd.f32 %v406_v7, %v264_v8 }
 0x1dd   :  { %v510_v10 = vpop.f32.mrf.mxu1 }
 0x1de   :  { %v268_v11 = vmax.f32 %v265_v9, 0.0 }
 0x1e0   :  { %378 = vmatmul.mubr.f32.vlgmr.msra.gmra.mxu0 %v268_v11 }
 0x2a0   :  { %v379_v19 = vpop.f32.mrf.mxu0 }
 0x2a1   :  { %v380_v20 = vadd.f32 %v379_v19, %v306_v17 }
 0x2a2   :  { %v381_v21 = vpop.f32.mrf.mxu0 }
 0x2a3   :  { %384 = vst [vmem:[#allocation10] sm:$0xff] %v380_v20  ;;  %v382_v22 = vadd.f32 %v381_v21, %v310_v18 }
 0x2a5   :  { %v385_v23 = vmax.f32 %v382_v22, -20.0 }
 0x2a7   :  { %v386_v24 = vmin.f32 %v385_v23, 2.0 }
 0x2a9   :  { %387 = vst [vmem:[#allocation10 + $0x8] sm:$0xff] %v386_v24 }
 0x2aa   :  { %613 = shalt.err (!%p610_p10)
}
 0x2ab   :  { %397 = dma.vmem_to_hbm [thread:$0]  %s395_s26, 256, %s747_s7, [#allocation4]  }
 0x2ac   :  { %628 = dma.done.wait [#allocation4], 256  }
 0x2ad   :  { %629 = vsyncadd [#allocation4], 4294967040 }
 0x2ae   :  { %401 = vsyncpa [#allocation3], 1 }
 0x2af   :  { %402 = vsyncpa [#allocation6], 1 }
 0x2b0   :  { %403 = vsyncpa [#allocation9], 1 }
 0x2b1   :  { %404 = vsyncpa [#allocation4], 1 }

</bundles_post_ra>
